<compile_context>
chip_gen: v7x
topology: tpu7x:2x2x1
jax: 0.10.0
libtpu: 0.0.40
codegen_flags: <defaults>
</compile_context>

<pallas_src>
import functools

import jax
import jax.numpy as jnp
from jax.experimental import pallas as pl
from jax.experimental.pallas import tpu as pltpu

_TWO_PI = 6.283185307179586
_INV_2_23 = 1.0 / float(1 << 23)
_ROW_BLOCK = 8  # sublane-dense row tile


def _target_noise_kernel(active_ref, lam_ref, bits_ref, out_ref):
    """One (ROW_BLOCK, dim_pad) tile: Box-Muller + per-row lambda*sigma scale."""
    blk = pl.program_id(0)
    is_active = active_ref[blk] != 0

    @pl.when(jnp.logical_not(is_active))
    def _zero():
        # All rows of this block have tta < 5 -> lambda_target == 0.
        out_ref[...] = jnp.zeros_like(out_ref)

    @pl.when(is_active)
    def _sample():
        d_half = out_ref.shape[-1] // 2
        # 23-bit uniform integers -> f32 uniforms in [0, 1).
        u = bits_ref[...].astype(jnp.float32) * jnp.float32(_INV_2_23)
        u1 = jnp.float32(1.0) - u[:, :d_half]   # (0, 1]  -> log() is safe
        u2 = u[:, d_half:]                      # [0, 1)
        # Dual-output Box-Muller: one (log, sqrt) chain feeds both halves.
        r = jnp.sqrt(jnp.float32(-2.0) * jnp.log(u1))
        t = jnp.float32(_TWO_PI) * u2
        z = jnp.concatenate([r * jnp.cos(t), r * jnp.sin(t)], axis=-1)
        # lam_ref is (ROW_BLOCK, 1): per-row lambda_target * sigma.
        out_ref[...] = lam_ref[...] * z


def _padded_sizes(batch, dim):
    b_pad = ((batch + _ROW_BLOCK - 1) // _ROW_BLOCK) * _ROW_BLOCK
    d_pad = ((dim + 127) // 128) * 128
    return b_pad, d_pad


def _prepare_inputs(tta, key, batch, dim, sigma):
    """Pad batch/dim, fold the piecewise lambda into a per-row scalar, draw bits."""
    b_pad, d_pad = _padded_sizes(batch, dim)
    tta_pad = jnp.zeros((b_pad,), jnp.int32).at[:batch].set(tta.astype(jnp.int32))
    # lambda_target = clip((tta - 5) / 25, 0, 1)  -- exactly the torch piecewise.
    lam = jnp.clip((tta_pad.astype(jnp.float32) - 5.0) / 25.0, 0.0, 1.0)
    lam_sigma = (lam * jnp.float32(sigma)).reshape(b_pad, 1)
    n_blocks = b_pad // _ROW_BLOCK
    active = jnp.any(
        (tta_pad >= 5).reshape(n_blocks, _ROW_BLOCK), axis=1
    ).astype(jnp.int32)
    # 23 bits of entropy per output element (same as the f32 mantissa trick).
    bits = jax.random.randint(key, (b_pad, d_pad), 0, 1 << 23, dtype=jnp.int32)
    return active, lam_sigma, bits, n_blocks, d_pad


@functools.partial(jax.jit, static_argnames=("dim", "sigma"))
def target_noise_embedding_batch(tta, key, *, dim, sigma):
    """lambda_target(tta) * N(0, sigma^2, (dim,)) for a batch of tta values.

    Args:
      tta:   int32 array (B,), frames away from the target frame (device-resident).
      key:   jax.random key used for the Gaussian draw (replaces torch global RNG).
      dim:   embedding dimension (static).
      sigma: noise std (static).

    Returns:
      float32 array of shape (B, dim).
    """
    batch = tta.shape[0]
    active, lam_sigma, bits, n_blocks, d_pad = _prepare_inputs(
        tta, key, batch, dim, sigma)

    out = pl.pallas_call(
        _target_noise_kernel,
        out_shape=jax.ShapeDtypeStruct((n_blocks * _ROW_BLOCK, d_pad), jnp.float32),
        grid_spec=pltpu.PrefetchScalarGridSpec(
            num_scalar_prefetch=0,
            grid=(n_blocks,),
            in_specs=[
                pl.BlockSpec(memory_space=pltpu.MemorySpace.SMEM),    # per-block flags
                pl.BlockSpec((_ROW_BLOCK, 1), lambda i: (i, 0)),      # lam * sigma
                pl.BlockSpec((_ROW_BLOCK, d_pad), lambda i: (i, 0)),  # uniform bits
            ],
            out_specs=pl.BlockSpec((_ROW_BLOCK, d_pad), lambda i: (i, 0)),
        ),
        compiler_params=pltpu.CompilerParams(
            dimension_semantics=("parallel",)),
    )(active, lam_sigma, bits)
    return out[:batch, :dim]


def target_noise_embedding(tta, key, *, dim, sigma):
    """Single-sample equivalent of TargetNoiseEmbedding(dim, sigma).forward(tta)."""
    tta_arr = jnp.atleast_1d(jnp.asarray(tta, dtype=jnp.int32))
    return target_noise_embedding_batch(tta_arr, key, dim=dim, sigma=sigma)[0]


def _reference_batch(tta, key, *, dim, sigma):
    """Pure-JAX mirror of the kernel math (correctness check)."""
    batch = tta.shape[0]
    _, lam_sigma, bits, _, d_pad = _prepare_inputs(tta, key, batch, dim, sigma)
    d_half = d_pad // 2
    u = bits.astype(jnp.float32) * jnp.float32(_INV_2_23)
    u1 = 1.0 - u[:, :d_half]
    u2 = u[:, d_half:]
    r = jnp.sqrt(-2.0 * jnp.log(u1))
    t = _TWO_PI * u2
    z = jnp.concatenate([r * jnp.cos(t), r * jnp.sin(t)], axis=-1)
    return (lam_sigma * z)[:batch, :dim]


if __name__ == "__main__":
    dim = 32
    sigma = 0.5

    key = jax.random.PRNGKey(0)
    # tta values covering all three lambda_target regimes:
    #   2 -> 0.0, 17 -> 0.48, 100 -> 1.0
    tta = jnp.asarray([2, 17, 100], dtype=jnp.int32)

    noise = jax.block_until_ready(
        target_noise_embedding_batch(tta, key, dim=dim, sigma=sigma))
    assert noise.shape == (3, dim) and noise.dtype == jnp.float32

    # tta < 5 -> lambda_target == 0 -> exact zeros.
    assert bool(jnp.all(noise[0] == 0.0))
    # Active rows must contain actual noise.
    assert bool(jnp.any(noise[1] != 0.0))
    assert bool(jnp.any(noise[2] != 0.0))

    # Match the pure-JAX reference of the same math.
    ref = jax.block_until_ready(_reference_batch(tta, key, dim=dim, sigma=sigma))
    assert jnp.allclose(noise, ref, rtol=1e-3, atol=1e-3)

    # Single-sample API parity with the torch module's forward(tta).
    single = jax.block_until_ready(
        target_noise_embedding(17, key, dim=dim, sigma=sigma))
    assert single.shape == (dim,) and single.dtype == jnp.float32

    print("KERNEL_OK")
</pallas_src>

<mosaic_0001>
module attributes {stable_mosaic.version = 11 : i64} {
  func.func @_target_noise_kernel(%arg0: i32, %arg1: memref<1xi32, #tpu.memory_space<smem>>, %arg2: memref<8x1xf32, #tpu.memory_space<vmem>>, %arg3: memref<8x128xi32, #tpu.memory_space<vmem>>, %arg4: memref<8x128xf32, #tpu.memory_space<vmem>>) attributes {dimension_semantics = [#tpu.dimension_semantics<parallel>], iteration_bounds = array<i64: 1>, scalar_prefetch = 0 : i64, scratch_operands = 0 : i64, tpu.core_type = #tpu.core_type<tc>, window_params = [{transform_indices = @transform_0, window_bounds = array<i64: 1>}, {transform_indices = @transform_1, window_bounds = array<i64: 8, 1>}, {transform_indices = @transform_2, window_bounds = array<i64: 8, 128>}, {transform_indices = @transform_3, window_bounds = array<i64: 8, 128>}]} {
    %0 = arith.index_cast %arg0 : i32 to index
    %1 = memref.load %arg1[%0] : memref<1xi32, #tpu.memory_space<smem>>
    %c0_i32 = arith.constant 0 : i32
    %2 = arith.cmpi ne, %1, %c0_i32 : i32
    %true = arith.constant true
    %3 = arith.xori %2, %true : i1
    %4 = arith.extui %3 : i1 to i32
    %c0_i32_0 = arith.constant 0 : i32
    %5 = arith.cmpi ne, %4, %c0_i32_0 : i32
    scf.if %5 {
      %cst = arith.constant 0.000000e+00 : f32
      %8 = vector.broadcast %cst : f32 to vector<8x128xf32>
      %c0 = arith.constant 0 : index
      %c0_2 = arith.constant 0 : index
      %9 = vector.load %arg4[%c0, %c0_2] : memref<8x128xf32, #tpu.memory_space<vmem>>, vector<8x128xf32>
      tpu.vector_store %arg4[%c0, %c0_2], %8 {strides = array<i32>} : memref<8x128xf32, #tpu.memory_space<vmem>>, vector<8x128xf32>,
    } else {
    }
    %6 = arith.extui %2 : i1 to i32
    %c0_i32_1 = arith.constant 0 : i32
    %7 = arith.cmpi ne, %6, %c0_i32_1 : i32
    scf.if %7 {
      %c0 = arith.constant 0 : index
      %c0_2 = arith.constant 0 : index
      %8 = vector.load %arg3[%c0, %c0_2] : memref<8x128xi32, #tpu.memory_space<vmem>>, vector<8x128xi32>
      %9 = arith.sitofp %8 : vector<8x128xi32> to vector<8x128xf32>
      %cst = arith.constant 1.1920929E-7 : f32
      %10 = vector.broadcast %cst : f32 to vector<8x128xf32>
      %11 = arith.mulf %9, %10 : vector<8x128xf32>
      %12 = vector.extract_strided_slice %11 {offsets = [0, 0], sizes = [8, 64], strides = [1, 1]} : vector<8x128xf32> to vector<8x64xf32>
      %cst_3 = arith.constant 1.000000e+00 : f32
      %13 = vector.broadcast %cst_3 : f32 to vector<8x64xf32>
      %14 = arith.subf %13, %12 : vector<8x64xf32>
      %15 = vector.extract_strided_slice %11 {offsets = [0, 64], sizes = [8, 64], strides = [1, 1]} : vector<8x128xf32> to vector<8x64xf32>
      %16 = math.log %14 : vector<8x64xf32>
      %cst_4 = arith.constant -2.000000e+00 : f32
      %17 = vector.broadcast %cst_4 : f32 to vector<8x64xf32>
      %18 = arith.mulf %17, %16 : vector<8x64xf32>
      %19 = math.sqrt %18 : vector<8x64xf32>
      %cst_5 = arith.constant 6.28318548 : f32
      %20 = vector.broadcast %cst_5 : f32 to vector<8x64xf32>
      %21 = arith.mulf %20, %15 : vector<8x64xf32>
      %22 = math.cos %21 : vector<8x64xf32>
      %23 = arith.mulf %19, %22 : vector<8x64xf32>
      %24 = math.sin %21 : vector<8x64xf32>
      %25 = arith.mulf %19, %24 : vector<8x64xf32>
      %26 = tpu.concatenate %23, %25 in 1 : vector<8x64xf32>, vector<8x64xf32> -> vector<8x128xf32>
      %c0_6 = arith.constant 0 : index
      %c0_7 = arith.constant 0 : index
      %27 = vector.load %arg2[%c0_6, %c0_7] : memref<8x1xf32, #tpu.memory_space<vmem>>, vector<8x1xf32>
      %28 = vector.broadcast %27 : vector<8x1xf32> to vector<8x128xf32>
      %29 = arith.mulf %28, %26 : vector<8x128xf32>
      %c0_8 = arith.constant 0 : index
      %c0_9 = arith.constant 0 : index
      %30 = vector.load %arg4[%c0_8, %c0_9] : memref<8x128xf32, #tpu.memory_space<vmem>>, vector<8x128xf32>
      tpu.vector_store %arg4[%c0_8, %c0_9], %29 {strides = array<i32>} : memref<8x128xf32, #tpu.memory_space<vmem>>, vector<8x128xf32>,
    } else {
    }
    return
  }
  func.func @transform_0(%arg0: i32) -> i32 {
    %c0_i32 = arith.constant 0 : i32
    %c0_i32_0 = arith.constant 0 : i32
    return %c0_i32 : i32
  }
  func.func @transform_1(%arg0: i32) -> (i32, i32) {
    %c0_i32 = arith.constant 0 : i32
    %c0_i32_0 = arith.constant 0 : i32
    return %arg0, %c0_i32 : i32, i32
  }
  func.func @transform_2(%arg0: i32) -> (i32, i32) {
    %c0_i32 = arith.constant 0 : i32
    %c0_i32_0 = arith.constant 0 : i32
    return %arg0, %c0_i32 : i32, i32
  }
  func.func @transform_3(%arg0: i32) -> (i32, i32) {
    %c0_i32 = arith.constant 0 : i32
    %c0_i32_0 = arith.constant 0 : i32
    return %arg0, %c0_i32 : i32, i32
  }
}

</mosaic_0001>

<bundles_post_ra>
// kernel: target_noise_embedding_batch.1
= control target key start
LH: loop header
LB: loop body
LE: loop exit
PB: predicated region body
PF: predicated region fallthrough
CT: control target
= control target key end

     0   :  { %s379_s0 = inlined_call_operand.<no memory space> [shape: s32[1], index: 0, kind: input, shape index: {}]   ;;  %s380_s1 = inlined_call_operand.vmem [shape: f32[8,1], index: 1, kind: input, shape index: {}]   ;;  %s381_s2 = inlined_call_operand.vmem [shape: s32[8,128], index: 2, kind: input, shape index: {}]   ;;  %s382_s3 = inlined_call_operand.vmem [shape: f32[8,128], index: 3, kind: output, shape index: {}]  }
   0x1   :  { %p275_p0 = scmp.ne.s32.totalorder %s379_s0, 0 }
   0x2   :  { %v307_v0 = vmov (!%p275_p0), 0.0  }
   0x3   :  { %20 = sbr.rel (%p275_p0) target bundleno = 10 (0xa), region = 17  ;;  %21 = vst [vmem:[%s382_s3] sm:$0xff] (!%p275_p0), %v307_v0 }
   0xa PF:  { %p276_p1 = scmp.eq.s32.totalorder %s379_s0, 0 }
   0xb   :  { %v25_v1 = vld [vmem:[%s381_s2] sm:$0xff] (!%p276_p1)  ;;  %v308_v4 = vmov (!%p276_p1), 0   ;;  %v309_v17 = vmov (!%p276_p1), 683565275   ;;  %v310_v19 = vmov (!%p276_p1), 2475754826  }
   0xc   :  { %24 = sbr.rel (%p276_p1) target bundleno = 334 (0x14e), region = 21  ;;  %v26_v2 = vcvt.s32.f32 (!%p276_p1), %v25_v1  ;;  %298 = vset.pattern.permute.xlu0 (!%p276_p1), %v308_v4  ;;  %v311_v21 = vmov (!%p276_p1), 2131351028   ;;  %v312_v23 = vmov (!%p276_p1), 2102212464   ;;  %s315_s0 = smov (!%p276_p1), 64  }
   0xd   :  { %v313_v25 = vmov (!%p276_p1), 920167782   ;;  %v314_v32 = vmov (!%p276_p1), 1326507024  }
   0xe   :  { %v348_v3 = vmul.f32 (!%p276_p1), 1.1920929e-07, %v26_v2 }
  0x10   :  { %v351_v5 = vmul.f32 (!%p276_p1), 6.2831855, %v348_v3 }
  0x12   :  { %v43_v6 = vand.u32 (!%p276_p1), 2139095040, %v351_v5  ;;  %v40_v8 = vand.u32 (!%p276_p1), 2147483647, %v351_v5  ;;  %vm42_vm7 = vcmp.lt.s32.totalorder (!%p276_p1), %v351_v5, 0  ;;  %vm132_vm15 = vweird.f32 (!%p276_p1), %v351_v5 }
  0x14   :  { %v44_v7 = vshrl.u32 %v43_v6, 23  ;;  %v47_v11 = vand.u32 8388607, %v40_v8  ;;  %vm41_vm8 = vcmp.le.f32.partialorder %v40_v8, 0.7853982 }
  0x16   :  { %v277_v9 = vadd.s32 4294967169, %v44_v7  ;;  %v48_v14 = vor.u32 8388608, %v47_v11 }
  0x18   :  { %v50_v10 = vadd.s32 1, %v277_v9  ;;  %v88_v34 = vshll.u32 %v48_v14, 8 }
  0x1a   :  { %vm51_vm0 = vcmp.gt.s32.totalorder %v50_v10, 0 }
  0x1b   :  { %v52_v12 = vsel %vm51_vm0, %v50_v10, 0 }
  0x1c   :  { %v54_v13 = vand.u32 31, %v52_v12  ;;  %v53_v15 = vshrl.u32 %v52_v12, 5 }
  0x1e   :  { %v55_v16 = vsub.s32 32, %v54_v13  ;;  %v57_v18 = vshll.u32 %v309_v17, %v54_v13  ;;  %v60_v20 = vshll.u32 %v310_v19, %v54_v13  ;;  %v63_v22 = vshll.u32 %v311_v21, %v54_v13 }
  0x1f   :  { %v66_v24 = vshll.u32 %v312_v23, %v54_v13  ;;  %v69_v26 = vshll.u32 %v313_v25, %v54_v13  ;;  %vm72_vm1 = vcmp.lt.s32.totalorder %v53_v15, 1  ;;  %vm75_vm2 = vcmp.lt.s32.totalorder %v53_v15, 4 }
  0x20   :  { %v56_v27 = vshrl.u32 %v309_v17, %v55_v16  ;;  %v58_v28 = vshrl.u32 %v310_v19, %v55_v16  ;;  %v61_v29 = vshrl.u32 %v311_v21, %v55_v16  ;;  %v64_v30 = vshrl.u32 %v312_v23, %v55_v16 }
  0x21   :  { %v67_v31 = vshrl.u32 %v313_v25, %v55_v16  ;;  %v70_v33 = vshrl.u32 %v314_v32, %v55_v16  ;;  %vm73_vm3 = vcmp.lt.s32.totalorder %v53_v15, 2  ;;  %vm74_vm4 = vcmp.lt.s32.totalorder %v53_v15, 3 }
  0x22   :  { %v59_v35 = vor.u32 %v58_v28, %v57_v18  ;;  %v62_v36 = vor.u32 %v61_v29, %v60_v20  ;;  %v65_v37 = vor.u32 %v64_v30, %v63_v22 }
  0x23   :  { %v68_v38 = vor.u32 %v67_v31, %v66_v24  ;;  %v71_v39 = vor.u32 %v70_v33, %v69_v26 }
  0x24   :  { %v76_v40 = vsel %vm72_vm1, %v56_v27, %v59_v35  ;;  %v77_v41 = vsel %vm75_vm2, %v65_v37, 2102212464  ;;  %v80_v42 = vsel %vm72_vm1, %v59_v35, %v62_v36  ;;  %v84_v43 = vsel %vm72_vm1, %v62_v36, %v65_v37 }
  0x25   :  { %v78_v44 = vsel %vm74_vm4, %v62_v36, %v77_v41  ;;  %v81_v45 = vsel %vm75_vm2, %v68_v38, 920167782  ;;  %v85_v46 = vsel %vm75_vm2, %v71_v39, 1326507024  ;;  %v28_v41 = vsub.f32 1.0, %v348_v3 }
  0x26   :  { %v82_v47 = vsel %vm74_vm4, %v65_v37, %v81_v45  ;;  %v86_v48 = vsel %vm74_vm4, %v68_v38, %v85_v46  ;;  %v79_v49 = vsel %vm73_vm3, %v76_v40, %v78_v44  ;;  %v263_v40 = vld [vmem:[%s380_s1] sm:$0xff]  ;;  %vm261_vm2 = vcmask 523264  }
  0x27   :  { %v83_v50 = vsel %vm73_vm3, %v80_v42, %v82_v47  ;;  %v87_v51 = vsel %vm73_vm3, %v84_v43, %v86_v48  ;;  %v95_v56 = vmul.u32 %v88_v34, %v79_v49 }
  0x28   :  { %v357_v52 = vmul.u32.u64.low %v88_v34, %v87_v51  ;;  %v358_v53 = vmul.u32.u64.high %v88_v34, %v87_v51, %v357_v52  ;;  %v360_v54 = vmul.u32.u64.low %v88_v34, %v83_v50  ;;  %v361_v55 = vmul.u32.u64.high %v88_v34, %v83_v50, %v360_v54 }
  0x2a   :  { %vm97_vm5 = vc.u32 %v358_v53, %v360_v54  ;;  %v98_v57 = vadd.s32 1, %v361_v55  ;;  %v96_v6 = vadd.s32 %v360_v54, %v358_v53 }
  0x2c   :  { %v99_v58 = vsel %vm97_vm5, %v98_v57, %v361_v55 }
  0x2d   :  { %v100_v59 = vadd.s32 %v99_v58, %v95_v56 }
  0x2f   :  { %v101_v60 = vadd.s32 536870912, %v100_v59 }
  0x31   :  { %v102_v61 = vshrl.u32 %v101_v60, 30 }
  0x33   :  { %v103_v62 = vshll.u32 %v102_v61, 30  ;;  %v126_v19 = vsub.s32 4, %v102_v61 }
  0x35   :  { %v104_v63 = vsub.s32 %v100_v59, %v103_v62  ;;  %v127_v22 = vsel %vm42_vm7, %v126_v19, %v102_v61 }
  0x36   :  { %v129_v25 = vsel %vm41_vm8, 0, %v127_v22 }
  0x37   :  { %v106_v0 = vsub.s32 0, %v104_v63  ;;  %v241_v26 = vadd.s32 3, %v129_v25  ;;  %v133_v28 = vand.u32 3, %v129_v25 }
  0x39   :  { %v278_v1 = vmin.u32 %v106_v0, %v104_v63  ;;  %v242_v27 = vand.u32 3, %v241_v26  ;;  %vm138_vm10 = vcmp.eq.s32.totalorder %v133_v28, 2  ;;  %vm135_vm12 = vcmp.eq.s32.totalorder %v133_v28, 0 }
  0x3a   :  { %vm134_vm14 = vcmp.lt.s32.totalorder %v133_v28, 2 }
  0x3b   :  { %v108_v2 = vclz %v278_v1  ;;  %vm247_vm9 = vcmp.eq.s32.totalorder %v242_v27, 2  ;;  %vm244_vm11 = vcmp.eq.s32.totalorder %v242_v27, 0  ;;  %vm243_vm13 = vcmp.lt.s32.totalorder %v242_v27, 2 }
  0x3d   :  { %v279_v4 = vadd.s32 4294967294, %v108_v2 }
  0x3f   :  { %vm280_vm6 = vcmp.lt.s32.totalorder %v279_v4, 0 }
  0x40   :  { %v111_v7 = vsel %vm280_vm6, 0, %v279_v4 }
  0x41   :  { %v112_v9 = vsub.s32 32, %v111_v7  ;;  %v113_v10 = vshll.u32 %v104_v63, %v111_v7  ;;  %v116_v11 = vsub.s32 4294967266, %v111_v7 }
  0x43   :  { %v114_v12 = vshrl.u32 %v96_v6, %v112_v9  ;;  %v117_v13 = vadd.s32 127, %v116_v11 }
  0x45   :  { %v115_v14 = vor.u32 %v114_v12, %v113_v10  ;;  %v118_v15 = vshll.u32 %v117_v13, 23 }
  0x47   :  { %v119_v16 = vor.u32 4788187, %v118_v15  ;;  %v122_v17 = vcvt.s32.f32 %v115_v14 }
  0x49   :  { %v120_v18 = vand.u32 2147483647, %v119_v16 }
  0x4b   :  { %v123_v20 = vmul.f32 %v122_v17, %v120_v18 }
  0x4d   :  { %v124_v21 = vxor.u32 2147483648, %v123_v20 }
  0x4f   :  { %v125_v23 = vsel %vm42_vm7, %v124_v21, %v123_v20 }
  0x50   :  { %v128_v24 = vsel %vm41_vm8, %v351_v5, %v125_v23 }
  0x51   :  { %299 = vcosq.f32 %v128_v24 }
  0x52   :  { %301 = vsinq.f32 %v128_v24 }
  0x53   :  { %303 = vlog2.f32 %v28_v41 }
  0x5b   :  { %v300_v29 = vpop.eup %299 }
  0x5c   :  { %v302_v30 = vpop.eup %301  ;;  %v139_v31 = vxor.u32 2147483648, %v300_v29 }
  0x5d   :  { %v136_v32 = vxor.u32 2147483648, %v302_v30  ;;  %v304_v5 = vpop.eup %303 }
  0x5e   :  { %v249_v8 = vsel %vm247_vm9, %v139_v31, %v302_v30  ;;  %v140_v33 = vsel %vm138_vm10, %v139_v31, %v302_v30  ;;  %v30_v42 = vmul.f32 0.6931472, %v304_v5 }
  0x5f   :  { %v246_v34 = vsel %vm244_vm11, %v300_v29, %v136_v32  ;;  %v137_v35 = vsel %vm135_vm12, %v300_v29, %v136_v32 }
  0x60   :  { %v250_v36 = vsel %vm243_vm13, %v246_v34, %v249_v8  ;;  %v141_v37 = vsel %vm134_vm14, %v137_v35, %v140_v33  ;;  %v31_v43 = vmul.f32 -2.0, %v30_v42 }
  0x61   :  { %v251_v38 = vsel %vm132_vm15, nan, %v250_v36  ;;  %v142_v39 = vsel %vm132_vm15, nan, %v141_v37 }
  0x62   :  { %253 = vrot.lane.b32.xlu0 %v251_v38, %s315_s0  ;;  %144 = vrot.lane.b32.xlu1 %v142_v39, %s315_s0  ;;  %305 = vrsqrt.f32 %v31_v43  ;;  %vm34_vm0 = vcmp.eq.f32.partialorder %v31_v43, inf  ;;  %v37_v46 = vand.u32 2147483648, %v31_v43  ;;  %vm36_vm1 = vcmp.eq.f32.partialorder %v31_v43, 0.0 }
  0x66   :  { %266 = vperm.xlu0 %298, %v263_v40  }
  0x6c   :  { %v306_v44 = vpop.eup %305 }
  0x6d   :  { %v33_v45 = vmul.f32 %v306_v44, %v31_v43 }
  0x6f   :  { %v35_v47 = vsel %vm34_vm0, %v31_v43, %v33_v45 }
  0x70   :  { %v38_v48 = vsel %vm36_vm1, %v37_v46, %v35_v47 }
  0xd4   :  { %v254_v49 = vpop.permute.xlu0 %253  ;;  %v145_v51 = vpop.permute.xlu1 %144 }
  0xd5   :  { %v256_v50 = vmul.f32 %v254_v49, %v38_v48  ;;  %v147_v52 = vmul.f32 %v145_v51, %v38_v48 }
  0xd7   :  { %258 = vrot.lane.b32.xlu1 %v256_v50, %s315_s0 }
  0xe5   :  { %v267_v53 = vpop.permute.xlu0 %266 }
 0x149   :  { %v259_v3 = vpop.permute.xlu1 %258 }
 0x14a   :  { %v262_v54 = vsel %vm261_vm2, %v147_v52, %v259_v3 }
 0x14b   :  { %v269_v55 = vmul.f32 %v267_v53, %v262_v54 }
 0x14d   :  { %270 = vst [vmem:[%s382_s3] sm:$0xff] %v269_v55 }
 0x14e PF:  {}

</bundles_post_ra>
